<compile_context>
chip_gen: v7x
topology: tpu7x:2x2x1
jax: 0.10.0
libtpu: 0.0.40
codegen_flags: <defaults>
</compile_context>

<pallas_src>
import functools

import jax
import jax.numpy as jnp
from jax.experimental import pallas as pl
from jax.experimental.pallas import tpu as pltpu

_OUT_LANES = 128  # packed head width per stream (>= action_size)


def _round_up(n, m):
    return ((n + m - 1) // m) * m


def _packed_heads(x, w1_ref, b1_ref, w2_ref, b2_ref, w3_ref, b3_ref, out_lanes):
    """Fused dual-stream MLP: 3 bf16 matmuls (f32 accum) / 2 ReLUs.

    Returns:
      val: (TB, out_lanes) f32  value replicated across all lanes (by the MXU)
      adv: (TB, out_lanes) f32  advantages in lanes [0, A); exact zeros elsewhere
    """
    h = jnp.dot(x, w1_ref[...], preferred_element_type=jnp.float32) + b1_ref[...]
    h = jnp.maximum(h, 0.0).astype(w2_ref.dtype)
    h = jnp.dot(h, w2_ref[...], preferred_element_type=jnp.float32) + b2_ref[...]
    h = jnp.maximum(h, 0.0).astype(w3_ref.dtype)
    h = jnp.dot(h, w3_ref[...], preferred_element_type=jnp.float32) + b3_ref[...]
    return h[:, :out_lanes], h[:, out_lanes:]


def _dueling_kernel_single(x_ref, w1_ref, b1_ref, w2_ref, b2_ref, w3_ref, b3_ref,
                           out_ref, *, batch, action_size, out_lanes):
    """Whole (8-padded) batch resident in one grid-less invocation."""
    val, adv = _packed_heads(x_ref[...], w1_ref, b1_ref, w2_ref, b2_ref,
                             w3_ref, b3_ref, out_lanes)
    rows = out_ref.shape[0]
    if rows != batch:
        # Mask batch-padding rows out of the global advantage mean.
        row = jax.lax.broadcasted_iota(jnp.int32, (rows, 1), 0)
        adv_valid = jnp.where(row < batch, adv, 0.0)
    else:
        adv_valid = adv
    # Global mean over (batch, action) as in torch's adv.mean(); padded lanes
    # [A, 128) are exact zeros so they do not perturb the sum.
    adv_mean = jnp.sum(adv_valid) * (1.0 / (batch * action_size))
    out_ref[...] = (val + adv - adv_mean)[:, :action_size]


def _dueling_kernel_tiled(x_ref, w1_ref, b1_ref, w2_ref, b2_ref, w3_ref, b3_ref,
                          qpre_ref, advsum_ref, *, batch, tile_batch,
                          action_size, out_lanes):
    """One batch tile per grid step; emits q_pre = val + adv (narrow, A lanes)
    and the tile's per-lane partial advantage sums (global mean applied in the
    wrapper epilogue)."""
    val, adv = _packed_heads(x_ref[...], w1_ref, b1_ref, w2_ref, b2_ref,
                             w3_ref, b3_ref, out_lanes)
    qpre_ref[...] = (val + adv)[:, :action_size]

    if batch % tile_batch == 0:
        adv_valid = adv
    else:
        # Mask batch-padding rows out of the global advantage sum.
        row = (pl.program_id(0) * tile_batch
               + jax.lax.broadcasted_iota(jnp.int32, (tile_batch, 1), 0))
        adv_valid = jnp.where(row < batch, adv, 0.0)
    col_sums = jnp.sum(adv_valid, axis=0, keepdims=True)          # (1, OUT)
    advsum_ref[...] = jnp.broadcast_to(col_sums[None], (1, 8, out_lanes))


def _pack_params(params, out_lanes):
    """Pack the two streams into block-diagonal bf16 weights (trace-time)."""
    (wv1, bv1, wv2, bv2, wv3, bv3,
     wa1, ba1, wa2, ba2, wa3, ba3) = params
    f32, bf16 = jnp.float32, jnp.bfloat16
    H1 = wv1.shape[1]
    H2 = wv2.shape[1]
    A = wa3.shape[1]
    assert A <= out_lanes, "action_size > 128 not supported by the packed head"

    W1 = jnp.concatenate([wv1, wa1], axis=1).astype(bf16)             # (S, 2H1)
    b1 = jnp.concatenate([bv1, ba1], axis=1).astype(f32)              # (1, 2H1)

    z2 = jnp.zeros((H1, H2), f32)
    W2 = jnp.concatenate(
        [jnp.concatenate([wv2.astype(f32), z2], axis=1),
         jnp.concatenate([z2, wa2.astype(f32)], axis=1)],
        axis=0).astype(bf16)                                          # (2H1,2H2)
    b2 = jnp.concatenate([bv2, ba2], axis=1).astype(f32)              # (1, 2H2)

    z3 = jnp.zeros((H2, out_lanes), f32)
    wv3_rep = jnp.tile(wv3.astype(f32), (1, out_lanes))               # (H2, 128)
    wa3_pad = jnp.pad(wa3.astype(f32), ((0, 0), (0, out_lanes - A)))  # (H2, 128)
    W3 = jnp.concatenate(
        [jnp.concatenate([wv3_rep, z3], axis=1),
         jnp.concatenate([z3, wa3_pad], axis=1)],
        axis=0).astype(bf16)                                          # (2H2,256)
    b3 = jnp.concatenate(
        [jnp.tile(bv3.astype(f32), (1, out_lanes)),
         jnp.pad(ba3.astype(f32), ((0, 0), (0, out_lanes - A)))],
        axis=1)                                                       # (1, 256)
    return W1, b1, W2, b2, W3, b3, A


def dueling_q_forward(x, params, *, block_batch=1024):
    B, S = x.shape
    OUT = _OUT_LANES
    W1, b1, W2, b2, W3, b3, A = _pack_params(params, OUT)
    x = x.astype(jnp.bfloat16)

    if B <= block_batch:
        # --- small batch: single grid-less invocation, everything in VMEM ---
        Bp = _round_up(B, 8)
        if Bp != B:
            x = jnp.pad(x, ((0, Bp - B), (0, 0)))
        kernel = functools.partial(_dueling_kernel_single,
                                   batch=B, action_size=A, out_lanes=OUT)
        q = pl.pallas_call(
            kernel,
            in_specs=[pl.BlockSpec(memory_space=pltpu.MemorySpace.VMEM)] * 7,
            out_specs=pl.BlockSpec(memory_space=pltpu.MemorySpace.VMEM),
            out_shape=jax.ShapeDtypeStruct((Bp, A), jnp.float32),
        )(x, W1, b1, W2, b2, W3, b3)
        return q[:B]

    # --- large batch: batch-tiled "parallel" grid, weights resident ---
    TB = _round_up(block_batch, 16)            # bf16-native sublane multiple
    num_tiles = pl.cdiv(B, TB)
    if num_tiles > 1 and num_tiles % 2 == 1:
        # v7x megacore: prefer an even number of parallel tiles (2 TCs/chip).
        tb_even = _round_up(pl.cdiv(B, num_tiles + 1), 16)
        if pl.cdiv(B, tb_even) % 2 == 0:
            TB = tb_even
            num_tiles = pl.cdiv(B, TB)
    Bp = num_tiles * TB
    if Bp != B:
        x = jnp.pad(x, ((0, Bp - B), (0, 0)))

    kernel = functools.partial(_dueling_kernel_tiled,
                               batch=B, tile_batch=TB,
                               action_size=A, out_lanes=OUT)
    q_pre, adv_part = pl.pallas_call(
        kernel,
        grid=(num_tiles,),
        in_specs=[
            pl.BlockSpec((TB, S), lambda i: (i, 0)),       # x: per-tile
            pl.BlockSpec(W1.shape, lambda i: (0, 0)),      # weights: resident
            pl.BlockSpec(b1.shape, lambda i: (0, 0)),
            pl.BlockSpec(W2.shape, lambda i: (0, 0)),
            pl.BlockSpec(b2.shape, lambda i: (0, 0)),
            pl.BlockSpec(W3.shape, lambda i: (0, 0)),
            pl.BlockSpec(b3.shape, lambda i: (0, 0)),
        ],
        out_specs=(
            pl.BlockSpec((TB, A), lambda i: (i, 0)),       # narrow q_pre
            pl.BlockSpec((1, 8, OUT), lambda i: (i, 0, 0)),  # per-lane adv sums
        ),
        out_shape=(
            jax.ShapeDtypeStruct((Bp, A), jnp.float32),
            jax.ShapeDtypeStruct((num_tiles, 8, OUT), jnp.float32),
        ),
        compiler_params=pltpu.CompilerParams(
            dimension_semantics=("parallel",),             # megacore on v7x
            vmem_limit_bytes=32 * 1024 * 1024),            # v5e default is 16MiB
    )(x, W1, b1, W2, b2, W3, b3)

    # Tiny XLA epilogue: exact global adv.mean() from the per-tile per-lane
    # partial sums (padded lanes are exact zeros), then the dueling combine.
    adv_mean = jnp.sum(adv_part[:, 0, :]) * (1.0 / (B * A))
    return q_pre[:B] - adv_mean


def init_params(key, state_size, action_size, fc1_units=128, fc2_units=128):
    """PyTorch-Linear-style init U(-1/sqrt(fan_in), 1/sqrt(fan_in)); weights
    stored pre-transposed as (in_features, out_features)."""
    def linear(k, fan_in, fan_out):
        kw, kb = jax.random.split(k)
        bound = 1.0 / jnp.sqrt(jnp.float32(fan_in))
        w = jax.random.uniform(kw, (fan_in, fan_out), jnp.float32, -bound, bound)
        b = jax.random.uniform(kb, (1, fan_out), jnp.float32, -bound, bound)
        return w, b

    keys = jax.random.split(key, 6)
    wv1, bv1 = linear(keys[0], state_size, fc1_units)
    wv2, bv2 = linear(keys[1], fc1_units, fc2_units)
    wv3, bv3 = linear(keys[2], fc2_units, 1)
    wa1, ba1 = linear(keys[3], state_size, fc1_units)
    wa2, ba2 = linear(keys[4], fc1_units, fc2_units)
    wa3, ba3 = linear(keys[5], fc2_units, action_size)
    return (wv1, bv1, wv2, bv2, wv3, bv3, wa1, ba1, wa2, ba2, wa3, ba3)


def reference_forward(x, params):
    """Pure-JAX f32 reference mirroring the PyTorch module (unpacked weights)."""
    (wv1, bv1, wv2, bv2, wv3, bv3,
     wa1, ba1, wa2, ba2, wa3, ba3) = params
    hv = jnp.maximum(x @ wv1 + bv1, 0.0)
    hv = jnp.maximum(hv @ wv2 + bv2, 0.0)
    val = hv @ wv3 + bv3
    ha = jnp.maximum(x @ wa1 + ba1, 0.0)
    ha = jnp.maximum(ha @ wa2 + ba2, 0.0)
    adv = ha @ wa3 + ba3
    return val + adv - adv.mean()


if __name__ == "__main__":
    state_size = 16
    action_size = 4
    batch = 8

    key = jax.random.PRNGKey(0)
    kx, kp, kx2, kx3 = jax.random.split(key, 4)

    x = jax.random.normal(kx, (batch, state_size), dtype=jnp.float32)
    params = init_params(kp, state_size, action_size, fc1_units=128, fc2_units=128)

    forward = jax.jit(dueling_q_forward, static_argnames=("block_batch",))

    # bf16 matmul operands (f32 accumulation) => compare to the f32 reference
    # with a relaxed tolerance.
    ATOL = 5e-2
    RTOL = 5e-2

    # Small batch -> grid-less single-invocation path.
    q = jax.block_until_ready(forward(x, params))
    q_ref = reference_forward(x, params)
    assert q.shape == (batch, action_size)
    assert jnp.allclose(q, q_ref, atol=ATOL, rtol=RTOL), "small-batch mismatch"

    # Small batch with B not a multiple of 8 -> padded/masked single path.
    x_odd = jax.random.normal(kx3, (5, state_size), dtype=jnp.float32)
    q_odd = jax.block_until_ready(forward(x_odd, params))
    q_odd_ref = reference_forward(x_odd, params)
    assert q_odd.shape == (5, action_size)
    assert jnp.allclose(q_odd, q_odd_ref, atol=ATOL, rtol=RTOL), "odd-batch mismatch"

    # Larger non-multiple batch -> batch-tiled "parallel" path (padding masked,
    # global adv.mean() preserved via per-tile per-lane partial sums).
    x_big = jax.random.normal(kx2, (300, state_size), dtype=jnp.float32)
    q_big = jax.block_until_ready(forward(x_big, params, block_batch=128))
    q_big_ref = reference_forward(x_big, params)
    assert q_big.shape == (300, action_size)
    assert jnp.allclose(q_big, q_big_ref, atol=ATOL, rtol=RTOL), "tiled mismatch"

    print("KERNEL_OK")
</pallas_src>

<mosaic_0001>
module attributes {stable_mosaic.version = 11 : i64} {
  func.func @_dueling_kernel_single(%arg0: memref<8x16xbf16, #tpu.memory_space<vmem>>, %arg1: memref<16x256xbf16, #tpu.memory_space<vmem>>, %arg2: memref<1x256xf32, #tpu.memory_space<vmem>>, %arg3: memref<256x256xbf16, #tpu.memory_space<vmem>>, %arg4: memref<1x256xf32, #tpu.memory_space<vmem>>, %arg5: memref<256x256xbf16, #tpu.memory_space<vmem>>, %arg6: memref<1x256xf32, #tpu.memory_space<vmem>>, %arg7: memref<8x4xf32, #tpu.memory_space<vmem>>) attributes {dimension_semantics = [], scalar_prefetch = 0 : i64, scratch_operands = 0 : i64, tpu.core_type = #tpu.core_type<tc>} {
    %c0 = arith.constant 0 : index
    %c0_0 = arith.constant 0 : index
    %0 = vector.load %arg0[%c0, %c0_0] : memref<8x16xbf16, #tpu.memory_space<vmem>>, vector<8x16xbf16>
    %c0_1 = arith.constant 0 : index
    %c0_2 = arith.constant 0 : index
    %1 = vector.load %arg1[%c0_1, %c0_2] : memref<16x256xbf16, #tpu.memory_space<vmem>>, vector<16x256xbf16>
    %cst = arith.constant dense<0.000000e+00> : vector<8x256xf32>
    %2 = tpu.matmul %0, %1, %cst {dimension_numbers = #tpu.dot_dimension_numbers<[1], [0], [0], [1], [0, 0, 1, 1], [], []>} : vector<8x16xbf16>, vector<16x256xbf16>, vector<8x256xf32> -> vector<8x256xf32>
    %c0_3 = arith.constant 0 : index
    %c0_4 = arith.constant 0 : index
    %3 = vector.load %arg2[%c0_3, %c0_4] : memref<1x256xf32, #tpu.memory_space<vmem>>, vector<1x256xf32>
    %4 = vector.broadcast %3 : vector<1x256xf32> to vector<8x256xf32>
    %5 = arith.addf %2, %4 : vector<8x256xf32>
    %cst_5 = arith.constant 0.000000e+00 : f32
    %6 = vector.broadcast %cst_5 : f32 to vector<8x256xf32>
    %7 = arith.maximumf %5, %6 : vector<8x256xf32>
    %8 = arith.truncf %7 : vector<8x256xf32> to vector<8x256xbf16>
    %c0_6 = arith.constant 0 : index
    %c0_7 = arith.constant 0 : index
    %9 = vector.load %arg3[%c0_6, %c0_7] : memref<256x256xbf16, #tpu.memory_space<vmem>>, vector<256x256xbf16>
    %cst_8 = arith.constant dense<0.000000e+00> : vector<8x256xf32>
    %10 = tpu.matmul %8, %9, %cst_8 {dimension_numbers = #tpu.dot_dimension_numbers<[1], [0], [0], [1], [0, 0, 1, 1], [], []>} : vector<8x256xbf16>, vector<256x256xbf16>, vector<8x256xf32> -> vector<8x256xf32>
    %c0_9 = arith.constant 0 : index
    %c0_10 = arith.constant 0 : index
    %11 = vector.load %arg4[%c0_9, %c0_10] : memref<1x256xf32, #tpu.memory_space<vmem>>, vector<1x256xf32>
    %12 = vector.broadcast %11 : vector<1x256xf32> to vector<8x256xf32>
    %13 = arith.addf %10, %12 : vector<8x256xf32>
    %cst_11 = arith.constant 0.000000e+00 : f32
    %14 = vector.broadcast %cst_11 : f32 to vector<8x256xf32>
    %15 = arith.maximumf %13, %14 : vector<8x256xf32>
    %16 = arith.truncf %15 : vector<8x256xf32> to vector<8x256xbf16>
    %c0_12 = arith.constant 0 : index
    %c0_13 = arith.constant 0 : index
    %17 = vector.load %arg5[%c0_12, %c0_13] : memref<256x256xbf16, #tpu.memory_space<vmem>>, vector<256x256xbf16>
    %cst_14 = arith.constant dense<0.000000e+00> : vector<8x256xf32>
    %18 = tpu.matmul %16, %17, %cst_14 {dimension_numbers = #tpu.dot_dimension_numbers<[1], [0], [0], [1], [0, 0, 1, 1], [], []>} : vector<8x256xbf16>, vector<256x256xbf16>, vector<8x256xf32> -> vector<8x256xf32>
    %c0_15 = arith.constant 0 : index
    %c0_16 = arith.constant 0 : index
    %19 = vector.load %arg6[%c0_15, %c0_16] : memref<1x256xf32, #tpu.memory_space<vmem>>, vector<1x256xf32>
    %20 = vector.broadcast %19 : vector<1x256xf32> to vector<8x256xf32>
    %21 = arith.addf %18, %20 : vector<8x256xf32>
    %22 = vector.extract_strided_slice %21 {offsets = [0, 0], sizes = [8, 128], strides = [1, 1]} : vector<8x256xf32> to vector<8x128xf32>
    %23 = vector.extract_strided_slice %21 {offsets = [0, 128], sizes = [8, 128], strides = [1, 1]} : vector<8x256xf32> to vector<8x128xf32>
    %24 = vector.shape_cast %23 : vector<8x128xf32> to vector<1x8x128xf32>
    %cst_17 = arith.constant dense<0.000000e+00> : vector<1xf32>
    %25 = vector.multi_reduction <add>, %24, %cst_17 [1, 2] : vector<1x8x128xf32> to vector<1xf32>
    %26 = vector.shape_cast %25 : vector<1xf32> to vector<1x1x1xf32>
    %27 = vector.extract %26[0, 0, 0] : f32 from vector<1x1x1xf32>
    %cst_18 = arith.constant 3.125000e-02 : f32
    %28 = arith.mulf %27, %cst_18 : f32
    %29 = arith.addf %22, %23 : vector<8x128xf32>
    %30 = vector.broadcast %28 : f32 to vector<8x128xf32>
    %31 = arith.subf %29, %30 : vector<8x128xf32>
    %32 = vector.extract_strided_slice %31 {offsets = [0, 0], sizes = [8, 4], strides = [1, 1]} : vector<8x128xf32> to vector<8x4xf32>
    %c0_19 = arith.constant 0 : index
    %c0_20 = arith.constant 0 : index
    %33 = vector.load %arg7[%c0_19, %c0_20] : memref<8x4xf32, #tpu.memory_space<vmem>>, vector<8x4xf32>
    tpu.vector_store %arg7[%c0_19, %c0_20], %32 {strides = array<i32>} : memref<8x4xf32, #tpu.memory_space<vmem>>, vector<8x4xf32>,
    return
  }
}

</mosaic_0001>

<bundles_post_ra>
// kernel: dueling_q_forward.1
= control target key start
LH: loop header
LB: loop body
LE: loop exit
PB: predicated region body
PF: predicated region fallthrough
CT: control target
= control target key end

     0   :  { %v783_v1 = vmov 0   ;;  %vm52_vm0 = vcmask 130048   ;;  %vm608_vm1 = vcmask 31744   ;;  %s1037_s1 = inlined_call_operand.vmem [shape: bf16[16,256], index: 1, kind: input, shape index: {}]   ;;  %s1038_s0 = inlined_call_operand.vmem [shape: bf16[8,16], index: 0, kind: input, shape index: {}]   ;;  %s1039_s3 = inlined_call_operand.vmem [shape: bf16[256,256], index: 3, kind: input, shape index: {}]   ;;  %s1040_s5 = inlined_call_operand.vmem [shape: bf16[256,256], index: 5, kind: input, shape index: {}]   ;;  %s1041_s2 = inlined_call_operand.vmem [shape: f32[1,256], index: 2, kind: input, shape index: {}]   ;;  %s1042_s4 = inlined_call_operand.vmem [shape: f32[1,256], index: 4, kind: input, shape index: {}]   ;;  %s1043_s6 = inlined_call_operand.vmem [shape: f32[1,256], index: 6, kind: input, shape index: {}]   ;;  %s1044_s7 = inlined_call_operand.vmem [shape: f32[8,4], index: 7, kind: output, shape index: {}]  }
   0x1   :  { %v684_v0 = vld [vmem:[%s1037_s1 + $0x4] ss:$8 sps:$4 sm:$0xff]   ;;  %88 = vmatprep.mubr.bf16.mxu0 %v783_v1  ;;  %v686_v2 = vld [vmem:[%s1037_s1] ss:$8 sps:$4 sm:$0xff]   ;;  %v690_v6 = vld [vmem:[%s1039_s3 + $0x14] ss:$8 sps:$4 sm:$0xff]  }
   0x2   :  { %v27_v3 = vld [vmem:[%s1038_s0] sm:$0xf]  ;;  %56 = vmatprep.subr.bf16.mxu0 %v684_v0  ;;  %v687_v4 = vld [vmem:[%s1039_s3 + $0x4] ss:$8 sps:$4 sm:$0xff]   ;;  %v692_v7 = vld [vmem:[%s1039_s3 + $0x10] ss:$8 sps:$4 sm:$0xff]   ;;  %v32_v0 = vlaneseq }
   0x3   :  { %v689_v5 = vld [vmem:[%s1039_s3] ss:$8 sps:$4 sm:$0xff]   ;;  %57 = vmatpush1.bf16.msra.mxu0 %v686_v2  ;;  %305 = vmatprep.subr.bf16.mxu1 %v687_v4  ;;  %v693_v8 = vld [vmem:[%s1039_s3 + $0x24] ss:$8 sps:$4 sm:$0xff]   ;;  %v696_v10 = vld [vmem:[%s1039_s3 + $0x34] ss:$8 sps:$4 sm:$0xff]  }
   0x4   :  { %306 = vmatpush1.bf16.msra.mxu1 %v689_v5  ;;  %v695_v9 = vld [vmem:[%s1039_s3 + $0x20] ss:$8 sps:$4 sm:$0xff]   ;;  %v698_v11 = vld [vmem:[%s1039_s3 + $0x30] ss:$8 sps:$4 sm:$0xff]   ;;  %v699_v12 = vld [vmem:[%s1039_s3 + $0x44] ss:$8 sps:$4 sm:$0xff]  }
   0x5   :  { %307 = vmatprep.subr.bf16.mxu1 %v690_v6  ;;  %v701_v13 = vld [vmem:[%s1039_s3 + $0x40] ss:$8 sps:$4 sm:$0xff]   ;;  %v702_v14 = vld [vmem:[%s1039_s3 + $0x54] ss:$8 sps:$4 sm:$0xff]   ;;  %v704_v15 = vld [vmem:[%s1039_s3 + $0x50] ss:$8 sps:$4 sm:$0xff]  }
   0x6   :  { %616 = vmatmul.mubr.msk.bf16.vlgmr.msra.gmra.mrb[0].mxu0 %vm52_vm0, %v27_v3  ;;  %v705_v16 = vld [vmem:[%s1039_s3 + $0x64] ss:$8 sps:$4 sm:$0xff]   ;;  %v707_v17 = vld [vmem:[%s1039_s3 + $0x60] ss:$8 sps:$4 sm:$0xff]   ;;  %v708_v18 = vld [vmem:[%s1039_s3 + $0x74] ss:$8 sps:$4 sm:$0xff]  }
   0x7   :  { %v710_v19 = vld [vmem:[%s1039_s3 + $0x70] ss:$8 sps:$4 sm:$0xff]   ;;  %v711_v20 = vld [vmem:[%s1039_s3 + $0x84] ss:$8 sps:$4 sm:$0xff]   ;;  %v713_v21 = vld [vmem:[%s1039_s3 + $0x80] ss:$8 sps:$4 sm:$0xff]  }
   0x8   :  { %308 = vmatpush1.bf16.msra.mxu1 %v692_v7  ;;  %v714_v22 = vld [vmem:[%s1039_s3 + $0x94] ss:$8 sps:$4 sm:$0xff]   ;;  %v716_v23 = vld [vmem:[%s1039_s3 + $0x90] ss:$8 sps:$4 sm:$0xff]   ;;  %v717_v24 = vld [vmem:[%s1039_s3 + $0xa4] ss:$8 sps:$4 sm:$0xff]  }
   0x9   :  { %309 = vmatprep.subr.bf16.mxu1 %v693_v8  ;;  %v719_v25 = vld [vmem:[%s1039_s3 + $0xa0] ss:$8 sps:$4 sm:$0xff]   ;;  %v720_v26 = vld [vmem:[%s1039_s3 + $0xb4] ss:$8 sps:$4 sm:$0xff]   ;;  %v722_v27 = vld [vmem:[%s1039_s3 + $0xb0] ss:$8 sps:$4 sm:$0xff]  }
   0xa   :  { %v723_v28 = vld [vmem:[%s1039_s3 + $0xc4] ss:$8 sps:$4 sm:$0xff]   ;;  %v725_v29 = vld [vmem:[%s1039_s3 + $0xc0] ss:$8 sps:$4 sm:$0xff]   ;;  %v726_v30 = vld [vmem:[%s1039_s3 + $0xd4] ss:$8 sps:$4 sm:$0xff]  }
   0xb   :  { %v728_v31 = vld [vmem:[%s1039_s3 + $0xd0] ss:$8 sps:$4 sm:$0xff]   ;;  %v729_v32 = vld [vmem:[%s1039_s3 + $0xe4] ss:$8 sps:$4 sm:$0xff]   ;;  %v731_v33 = vld [vmem:[%s1039_s3 + $0xe0] ss:$8 sps:$4 sm:$0xff]  }
   0xc   :  { %310 = vmatpush1.bf16.msra.mxu1 %v695_v9  ;;  %v732_v34 = vld [vmem:[%s1039_s3 + $0xf4] ss:$8 sps:$4 sm:$0xff]   ;;  %v734_v35 = vld [vmem:[%s1039_s3 + $0xf0] ss:$8 sps:$4 sm:$0xff]   ;;  %v735_v36 = vld [vmem:[%s1040_s5] ss:$8 sps:$4 sm:$0xff]  }
   0xd   :  { %311 = vmatprep.subr.bf16.mxu1 %v696_v10  ;;  %v737_v37 = vld [vmem:[%s1040_s5 + $0x4] ss:$8 sps:$4 sm:$0xff]   ;;  %v740_v38 = vld [vmem:[%s1040_s5 + $0x14] ss:$8 sps:$4 sm:$0xff]   ;;  %v738_v39 = vld [vmem:[%s1040_s5 + $0x10] ss:$8 sps:$4 sm:$0xff]  }
   0xe   :  { %554 = vmatprep.subr.bf16.mxu0 %v737_v37  ;;  %v743_v40 = vld [vmem:[%s1040_s5 + $0x24] ss:$8 sps:$4 sm:$0xff]   ;;  %v741_v41 = vld [vmem:[%s1040_s5 + $0x20] ss:$8 sps:$4 sm:$0xff]   ;;  %v746_v42 = vld [vmem:[%s1040_s5 + $0x34] ss:$8 sps:$4 sm:$0xff]  }
   0xf   :  { %555 = vmatpush1.bf16.msra.mxu0 %v735_v36  ;;  %v744_v43 = vld [vmem:[%s1040_s5 + $0x30] ss:$8 sps:$4 sm:$0xff]   ;;  %v749_v44 = vld [vmem:[%s1040_s5 + $0x44] ss:$8 sps:$4 sm:$0xff]   ;;  %v747_v45 = vld [vmem:[%s1040_s5 + $0x40] ss:$8 sps:$4 sm:$0xff]  }
  0x10   :  { %312 = vmatpush1.bf16.msra.mxu1 %v698_v11  ;;  %556 = vmatprep.subr.bf16.mxu0 %v740_v38  ;;  %v752_v46 = vld [vmem:[%s1040_s5 + $0x54] ss:$8 sps:$4 sm:$0xff]   ;;  %v750_v47 = vld [vmem:[%s1040_s5 + $0x50] ss:$8 sps:$4 sm:$0xff]   ;;  %v755_v48 = vld [vmem:[%s1040_s5 + $0x64] ss:$8 sps:$4 sm:$0xff]  }
  0x11   :  { %313 = vmatprep.subr.bf16.mxu1 %v699_v12  ;;  %v753_v49 = vld [vmem:[%s1040_s5 + $0x60] ss:$8 sps:$4 sm:$0xff]   ;;  %v758_v50 = vld [vmem:[%s1040_s5 + $0x74] ss:$8 sps:$4 sm:$0xff]   ;;  %v756_v51 = vld [vmem:[%s1040_s5 + $0x70] ss:$8 sps:$4 sm:$0xff]  }
  0x12   :  { %v761_v52 = vld [vmem:[%s1040_s5 + $0x84] ss:$8 sps:$4 sm:$0xff]   ;;  %v759_v53 = vld [vmem:[%s1040_s5 + $0x80] ss:$8 sps:$4 sm:$0xff]   ;;  %v764_v54 = vld [vmem:[%s1040_s5 + $0x94] ss:$8 sps:$4 sm:$0xff]  }
  0x13   :  { %557 = vmatpush1.bf16.msra.mxu0 %v738_v39  ;;  %v762_v55 = vld [vmem:[%s1040_s5 + $0x90] ss:$8 sps:$4 sm:$0xff]   ;;  %v767_v56 = vld [vmem:[%s1040_s5 + $0xa4] ss:$8 sps:$4 sm:$0xff]   ;;  %v765_v57 = vld [vmem:[%s1040_s5 + $0xa0] ss:$8 sps:$4 sm:$0xff]  }
  0x14   :  { %314 = vmatpush1.bf16.msra.mxu1 %v701_v13  ;;  %558 = vmatprep.subr.bf16.mxu0 %v743_v40  ;;  %v770_v58 = vld [vmem:[%s1040_s5 + $0xb4] ss:$8 sps:$4 sm:$0xff]   ;;  %v768_v59 = vld [vmem:[%s1040_s5 + $0xb0] ss:$8 sps:$4 sm:$0xff]   ;;  %v773_v60 = vld [vmem:[%s1040_s5 + $0xc4] ss:$8 sps:$4 sm:$0xff]  }
  0x15   :  { %315 = vmatprep.subr.bf16.mxu1 %v702_v14  ;;  %v771_v61 = vld [vmem:[%s1040_s5 + $0xc0] ss:$8 sps:$4 sm:$0xff]   ;;  %v776_v62 = vld [vmem:[%s1040_s5 + $0xd4] ss:$8 sps:$4 sm:$0xff]   ;;  %v774_v63 = vld [vmem:[%s1040_s5 + $0xd0] ss:$8 sps:$4 sm:$0xff]  }
  0x16   :  { %v33_v1 = vshrl.u32 %v32_v0, 7  ;;  %v30_v3 = vld [vmem:[%s1041_s2] sm:$0x3] }
  0x17   :  { %559 = vmatpush1.bf16.msra.mxu0 %v741_v41 }
  0x18   :  { %316 = vmatpush1.bf16.msra.mxu1 %v704_v15  ;;  %560 = vmatprep.subr.bf16.mxu0 %v746_v42  ;;  %v34_v2 = vsub.s32 0, %v33_v1  ;;  %v38_v4 = vsub.s32 1, %v33_v1 }
  0x19   :  { %317 = vmatprep.subr.bf16.mxu1 %v705_v16 }
  0x1a   :  { %v35_v5 = vrot.slane %v30_v3, %v34_v2  ;;  %v39_v6 = vrot.slane %v30_v3, %v38_v4 }
  0x1b   :  { %561 = vmatpush1.bf16.msra.mxu0 %v744_v43 }
  0x1c   :  { %318 = vmatpush1.bf16.msra.mxu1 %v707_v17  ;;  %562 = vmatprep.subr.bf16.mxu0 %v749_v44  ;;  %v779_v17 = vld [vmem:[%s1040_s5 + $0xe4] ss:$8 sps:$4 sm:$0xff]  }
  0x1d   :  { %319 = vmatprep.subr.bf16.mxu1 %v708_v18  ;;  %v777_v18 = vld [vmem:[%s1040_s5 + $0xe0] ss:$8 sps:$4 sm:$0xff]  }
  0x1f   :  { %563 = vmatpush1.bf16.msra.mxu0 %v747_v45 }
  0x20   :  { %320 = vmatpush1.bf16.msra.mxu1 %v710_v19  ;;  %564 = vmatprep.subr.bf16.mxu0 %v752_v46  ;;  %v782_v19 = vld [vmem:[%s1040_s5 + $0xf4] ss:$8 sps:$4 sm:$0xff]  }
  0x21   :  { %321 = vmatprep.subr.bf16.mxu1 %v711_v20  ;;  %v780_v20 = vld [vmem:[%s1040_s5 + $0xf0] ss:$8 sps:$4 sm:$0xff]  }
  0x23   :  { %565 = vmatpush1.bf16.msra.mxu0 %v750_v47 }
  0x24   :  { %322 = vmatpush1.bf16.msra.mxu1 %v713_v21  ;;  %566 = vmatprep.subr.bf16.mxu0 %v755_v48  ;;  %v133_v21 = vld [vmem:[%s1042_s4] sm:$0x3] }
  0x25   :  { %323 = vmatprep.subr.bf16.mxu1 %v714_v22  ;;  %v138_v22 = vrot.slane %v133_v21, %v34_v2 }
  0x27   :  { %567 = vmatpush1.bf16.msra.mxu0 %v753_v49 }
  0x28   :  { %324 = vmatpush1.bf16.msra.mxu1 %v716_v23  ;;  %568 = vmatprep.subr.bf16.mxu0 %v758_v50  ;;  %v142_v23 = vrot.slane %v133_v21, %v38_v4 }
  0x29   :  { %325 = vmatprep.subr.bf16.mxu1 %v717_v24 }
  0x2b   :  { %569 = vmatpush1.bf16.msra.mxu0 %v756_v51 }
  0x2c   :  { %326 = vmatpush1.bf16.msra.mxu1 %v719_v25  ;;  %570 = vmatprep.subr.bf16.mxu0 %v761_v52 }
  0x2d   :  { %327 = vmatprep.subr.bf16.mxu1 %v720_v26 }
  0x2f   :  { %571 = vmatpush1.bf16.msra.mxu0 %v759_v53 }
  0x30   :  { %328 = vmatpush1.bf16.msra.mxu1 %v722_v27  ;;  %572 = vmatprep.subr.bf16.mxu0 %v764_v54 }
  0x31   :  { %329 = vmatprep.subr.bf16.mxu1 %v723_v28 }
  0x33   :  { %573 = vmatpush1.bf16.msra.mxu0 %v762_v55 }
  0x34   :  { %330 = vmatpush1.bf16.msra.mxu1 %v725_v29  ;;  %574 = vmatprep.subr.bf16.mxu0 %v767_v56 }
  0x35   :  { %331 = vmatprep.subr.bf16.mxu1 %v726_v30 }
  0x37   :  { %575 = vmatpush1.bf16.msra.mxu0 %v765_v57 }
  0x38   :  { %332 = vmatpush1.bf16.msra.mxu1 %v728_v31  ;;  %576 = vmatprep.subr.bf16.mxu0 %v770_v58 }
  0x39   :  { %333 = vmatprep.subr.bf16.mxu1 %v729_v32 }
  0x3b   :  { %577 = vmatpush1.bf16.msra.mxu0 %v768_v59 }
  0x3c   :  { %334 = vmatpush1.bf16.msra.mxu1 %v731_v33  ;;  %578 = vmatprep.subr.bf16.mxu0 %v773_v60 }
  0x3d   :  { %335 = vmatprep.subr.bf16.mxu1 %v732_v34  ;;  %v382_v34 = vld [vmem:[%s1043_s6] sm:$0x3] }
  0x3e   :  { %v391_v36 = vrot.slane %v382_v34, %v38_v4 }
  0x3f   :  { %579 = vmatpush1.bf16.msra.mxu0 %v771_v61 }
  0x40   :  { %336 = vmatpush1.bf16.msra.mxu1 %v734_v35  ;;  %580 = vmatprep.subr.bf16.mxu0 %v776_v62  ;;  %v387_v35 = vrot.slane %v382_v34, %v34_v2 }
  0x43   :  { %581 = vmatpush1.bf16.msra.mxu0 %v774_v63 }
  0x44   :  { %582 = vmatprep.subr.bf16.mxu0 %v779_v17 }
  0x47   :  { %583 = vmatpush1.bf16.msra.mxu0 %v777_v18 }
  0x48   :  { %584 = vmatprep.subr.bf16.mxu0 %v782_v19 }
  0x4b   :  { %585 = vmatpush1.bf16.msra.mxu0 %v780_v20 }
  0xd9   :  { %v90_v7 = vpop.f32.mrb[0].mxu0 }
  0xda   :  { %v91_v8 = vadd.f32 %v90_v7, %v35_v5  ;;  %v92_v9 = vpop.f32.mrb[1].mxu0 }
  0xdb   :  { %v93_v10 = vadd.f32 %v92_v9, %v39_v6  ;;  %v94_v11 = vpop.f32.mrb[2].mxu0 }
  0xdc   :  { %v97_v12 = vmax.f32 %v91_v8, 0.0  ;;  %v95_v13 = vpop.f32.mrb[3].mxu0 }
  0xdd   :  { %v98_v14 = vmax.f32 %v93_v10, 0.0 }
  0xde   :  { %v99_v16 = vpack.c.bf16 %v97_v12, %v97_v12 }
  0xdf   :  { %v100_v15 = vpack.c.bf16 %v98_v14, %v98_v14 }
  0xe1   :  { %337 = vmatprep.mubr.bf16.mxu1 %v100_v15 }
  0xe2   :  { %338 = vmatmul.mubr.bf16.vlgmr.msra.gmra.mrb[0].mxu1 %v99_v16 }
 0x1b5   :  { %v339_v24 = vpop.f32.mrb[0].mxu1 }
 0x1b6   :  { %v340_v25 = vadd.f32 %v339_v24, %v138_v22  ;;  %v341_v26 = vpop.f32.mrb[1].mxu1 }
 0x1b7   :  { %v342_v27 = vadd.f32 %v341_v26, %v142_v23  ;;  %v343_v28 = vpop.f32.mrb[2].mxu1 }
 0x1b8   :  { %v346_v29 = vmax.f32 %v340_v25, 0.0  ;;  %v344_v30 = vpop.f32.mrb[3].mxu1 }
 0x1b9   :  { %v347_v31 = vmax.f32 %v342_v27, 0.0 }
 0x1ba   :  { %v348_v33 = vpack.c.bf16 %v346_v29, %v346_v29 }
 0x1bb   :  { %v349_v32 = vpack.c.bf16 %v347_v31, %v347_v31 }
 0x1bd   :  { %586 = vmatprep.mubr.bf16.mxu0 %v349_v32 }
 0x1be   :  { %587 = vmatmul.mubr.bf16.vlgmr.msra.gmra.mrb[4].mxu0 %v348_v33 }
 0x291   :  { %v588_v37 = vpop.f32.mrb[4].mxu0 }
 0x292   :  { %v589_v38 = vadd.f32 %v588_v37, %v387_v35  ;;  %v590_v39 = vpop.f32.mrb[5].mxu0 }
 0x293   :  { %v591_v40 = vadd.f32 %v590_v39, %v391_v36  ;;  %v592_v41 = vpop.f32.mrb[6].mxu0 }
 0x294   :  { %v593_v42 = vpop.f32.mrb[7].mxu0 }
 0x295   :  { %v605_v43 = vadd.f32 %v591_v40, %v589_v38  ;;  %595 = vadd.xlane.f32.xlu0 %v591_v40 }
 0x322   :  { %v596_v44 = vpop.xlane.xlu0 %595 }
 0x323   :  { %v597_v45 = vrot.slane %v596_v44, 4 }
 0x325   :  { %v598_v46 = vadd.f32 %v597_v45, %v596_v44 }
 0x327   :  { %v599_v47 = vrot.slane %v598_v46, 2 }
 0x329   :  { %v600_v48 = vadd.f32 %v599_v47, %v598_v46 }
 0x32b   :  { %v601_v49 = vrot.slane %v600_v48, 1 }
 0x32d   :  { %v602_v50 = vadd.f32 %v601_v49, %v600_v48 }
 0x32f   :  { %681 = vpush %v602_v50 }
 0x360   :  { %s682_s4 = spop %681 }
 0x361   :  { %s604_s6 = smul.f32 0.03125, %s682_s4 }
 0x363   :  { %v606_v51 = vstv %s604_s6 }
 0x364   :  { %v607_v52 = vsub.f32 %v605_v43, %v606_v51 }
 0x366   :  { %609 = vst.msk [vmem:[%s1044_s7] sm:$0xff] %vm608_vm1, %v607_v52 }

</bundles_post_ra>
